<compile_context>
chip_gen: v7x
topology: tpu7x:2x2x1
jax: 0.10.0
libtpu: 0.0.40
codegen_flags: <defaults>
</compile_context>

<pallas_src>
import math

import jax
import jax.numpy as jnp
from jax.experimental import pallas as pl
from jax.experimental.pallas import tpu as pltpu

# Row indices inside the packed (8, D) per-call vector slab.
_XT, _DR, _BVP, _GAMMA, _BETA, _B1, _B2, _SR = range(8)


def _layernorm(x, gamma, beta, eps=1e-5):
    mu = jnp.mean(x, axis=-1, keepdims=True)
    var = jnp.mean((x - mu) ** 2, axis=-1, keepdims=True)
    return (x - mu) * jax.lax.rsqrt(var + eps) * gamma + beta


def ica_kernel(y_ref, slab_ref, ws_ref, wvp_ref, wmlp_ref, out_ref):
    f32 = jnp.float32
    nc = y_ref.shape[1]          # N * C (tokens flattened into lanes)
    n = ws_ref.shape[1]          # N tokens
    c = nc // n                  # channels per token
    mm = wvp_ref.dtype           # matmul-operand dtype (f32 or bf16)

    slab = slab_ref[...]                          # (8, D) f32, grid-resident
    x_t   = slab[_XT:_XT + 1, :]
    d_r   = slab[_DR:_DR + 1, :]                  # v_r - b_vp
    b_vp  = slab[_BVP:_BVP + 1, :]                # bp@Wv + bv
    gamma = slab[_GAMMA:_GAMMA + 1, :]
    beta  = slab[_BETA:_BETA + 1, :]
    b1    = slab[_B1:_B1 + 1, :]
    b2    = slab[_B2:_B2 + 1, :]
    s_r   = slab[_SR:_SR + 1, 0:1]                # (1,1) x_r logit (bias-folded)

    # ---- single-query attention over [x_r] ++ tokens, all in C-space ------
    y = y_ref[...]                                # (BT, N*C), mm dtype
    # token logits: one dense MXU call (q already folded into ws_ref)
    s = jnp.dot(y, ws_ref[...], preferred_element_type=f32)        # (BT, N)
    m = jnp.maximum(jnp.max(s, axis=-1, keepdims=True), s_r)       # (BT, 1)
    e = jnp.exp(s - m)                                             # (BT, N)
    e_r = jnp.exp(s_r - m)                                         # (BT, 1)
    inv = pl.reciprocal(jnp.sum(e, axis=-1, keepdims=True) + e_r, approx=True)
    p = e * inv                                                    # (BT, N)
    p_r = e_r * inv                                                # (BT, 1)

    # Broadcast p over the C lanes of each token segment with a tiny 0/1
    # matmul (pb[b, n*C + c] = p[b, n]); the 0/1 pattern is generated from
    # iota so it costs no operand / DMA and stays a clean 2-D MXU call.
    row = jax.lax.broadcasted_iota(jnp.int32, (n, nc), 0)
    col = jax.lax.broadcasted_iota(jnp.int32, (n, nc), 1)
    seg = jnp.where((col >= row * c) & (col < row * c + c), 1.0, 0.0)  # (N, N*C) f32
    pb = jnp.dot(p, seg, preferred_element_type=f32)               # (BT, N*C)

    # z = (sum_n p_n Y_n) @ (Wp@Wv) + b_vp + p_r * (v_r - b_vp)
    z = jnp.dot((pb * y.astype(f32)).astype(mm), wvp_ref[...],
                preferred_element_type=f32)                        # (BT, D)
    z = z + b_vp + p_r * d_r

    # ---- residual + LayerNorm + MLP ---------------------------------------
    e1 = x_t + _layernorm(z, gamma, beta)                          # (BT, D)
    n1 = _layernorm(e1, gamma, beta)
    h1 = jnp.maximum(
        jnp.dot(n1.astype(mm), wmlp_ref[0], preferred_element_type=f32) + b1,
        0.0)
    mlp = jnp.dot(h1.astype(mm), wmlp_ref[1], preferred_element_type=f32) + b2
    out_ref[...] = (e1 + mlp).astype(out_ref.dtype)


def fuse_params(params, l):
    """Offline, exact algebraic packing/fusion of the module parameters.

    Everything here is independent of the runtime inputs (Y, x_t); the
    x_t-dependent folds happen once per call in `ica_forward`.
    """
    f32 = jnp.float32
    scale = 1.0 / math.sqrt(l)
    wk, wv, bk, bv = params['wk'], params['wv'], params['bk'], params['bv']
    wp, bp = params['wp'], params['bp']
    b_vp = (bp @ wv + bv).astype(f32)                    # V bias of projected tokens
    d_r = (params['x_r'] @ wv + bv - b_vp).astype(f32)   # v_r - b_vp
    return {
        'wq_s': (params['wq'] * scale).astype(f32),      # (D,D) softmax scale folded in
        'bq_s': (params['bq'] * scale).astype(f32),      # (1,D)
        'wkp_t': (wp @ wk).T.astype(f32),                # (D,C): q -> token score weight
        # x_r logit with the token score bias folded out (bk cancels):
        'kr_fold': ((params['x_r'] - bp) @ wk).astype(f32),  # (1,D)
        'w_vp': (wp @ wv).astype(f32),                   # (C,D): token value weight
        'const_rows': jnp.concatenate(
            [d_r, b_vp, params['gamma'], params['beta'],
             params['b1'], params['b2']], axis=0).astype(f32),   # (6,D)
        'wmlp': jnp.stack([params['w1'], params['w2']], axis=0).astype(f32),  # (2,D,D)
    }


def _pick_batch_tile(b, row_bytes, *, target_bytes=512 * 1024, min_steps=4):
    """Pick a batch tile (always a divisor of b).

    Small problems run as one resident step (grid=(1,)): the ~0.35 us/step
    fixed cost + DMA prime/drain would dominate any pipeline.  Large problems
    get a multiple-of-8 tile giving a ~target_bytes Y block and >= min_steps
    grid steps so double/triple buffering (and v7x's 2 TensorCores with the
    'parallel' axis) have real work to overlap.
    """
    if b * row_bytes <= target_bytes or b < 2 * min_steps:
        return b
    divisors = [d for d in range(1, b + 1)
                if b % d == 0 and (d % 8 == 0 or d == b)]
    good = [d for d in divisors
            if b // d >= min_steps and d * row_bytes <= target_bytes]
    if good:
        return max(good)
    ok = [d for d in divisors if b // d >= min_steps]
    return max(ok) if ok else b


def ica_forward(Y, x_t, fused, *, batch_tile=None, mxu_dtype=jnp.bfloat16):
    f32 = jnp.float32
    B, N, C = Y.shape
    D = x_t.shape[-1]
    NC = N * C

    # ---- per-call folds: x_t is shared by the whole batch, so q and every
    # quantity derived from it is computed once here, never per grid step ----
    qs = x_t.astype(f32) @ fused['wq_s'] + fused['bq_s']            # (1,D)
    w_s = qs @ fused['wkp_t']                                       # (1,C)
    s_r = qs @ fused['kr_fold'].T                                   # (1,1)
    ws_blk = jnp.kron(jnp.eye(N, dtype=f32), w_s.reshape(C, 1))     # (N*C, N)
    wvp_rep = jnp.tile(fused['w_vp'], (N, 1))                       # (N*C, D)
    slab = jnp.concatenate(
        [x_t.astype(f32), fused['const_rows'], jnp.broadcast_to(s_r, (1, D))],
        axis=0)                                                     # (8, D) f32

    # Lane-dense token layout: (B, N*C) instead of B padded (N, C) planes.
    y2 = Y.reshape(B, NC).astype(mxu_dtype)
    ws_blk = ws_blk.astype(mxu_dtype)
    wvp_rep = wvp_rep.astype(mxu_dtype)
    wmlp = fused['wmlp'].astype(mxu_dtype)

    # ---- batch tiling ----
    if batch_tile is None:
        BT = _pick_batch_tile(B, NC * y2.dtype.itemsize)
    else:
        BT = batch_tile
        if B % BT != 0 or not (BT % 8 == 0 or BT == B):
            raise ValueError(
                f"batch_tile={BT} must divide B={B} and be a multiple of 8 "
                f"(or equal to B)")
    steps = B // BT

    y_spec = pl.BlockSpec((BT, NC), lambda i: (i, 0))
    if steps >= 4:
        # With a real pipeline, a third Y buffer hides DMA jitter.
        y_spec = pl.BlockSpec((BT, NC), lambda i: (i, 0),
                              pipeline_mode=pl.Buffered(3))

    flops = 2 * B * (NC * N + N * NC + NC * D + 2 * D * D) + 12 * B * D
    bytes_accessed = (
        y2.size * y2.dtype.itemsize + B * D * 4 + slab.size * 4
        + (ws_blk.size + wvp_rep.size + wmlp.size) * jnp.dtype(mxu_dtype).itemsize)

    return pl.pallas_call(
        ica_kernel,
        grid=(steps,),
        in_specs=[
            y_spec,                                         # tokens: batch-pipelined
            pl.BlockSpec((8, D), lambda i: (0, 0)),         # packed (1,D) vectors + s_r
            pl.BlockSpec((NC, N), lambda i: (0, 0)),        # block-diag score weight
            pl.BlockSpec((NC, D), lambda i: (0, 0)),        # tiled Wp@Wv value weight
            pl.BlockSpec((2, D, D), lambda i: (0, 0, 0)),   # MLP W1 | W2
        ],
        # (B, D) kept to match the module; a (B//4, 4*D) consumer-side view
        # would give unmasked lane-dense stores if ever needed.
        out_specs=pl.BlockSpec((BT, D), lambda i: (i, 0)),
        out_shape=jax.ShapeDtypeStruct((B, D), f32),
        compiler_params=pltpu.CompilerParams(
            dimension_semantics=("parallel",)),             # megacore / v7x 2-TC split
        cost_estimate=pl.CostEstimate(
            flops=int(flops),
            transcendentals=int(B * (N + 2)),
            bytes_accessed=int(bytes_accessed)),
    )(y2, slab, ws_blk, wvp_rep, wmlp)


def ica_reference(Y, x_t, p, l):
    """Pure-JAX reference matching the PyTorch forward exactly."""
    B = Y.shape[0]
    X_p = Y @ p['wp'] + p['bp']
    xt = jnp.broadcast_to(x_t, (B, x_t.shape[-1]))
    xr = jnp.broadcast_to(p['x_r'], (B, p['x_r'].shape[-1]))
    Q = (xt @ p['wq'] + p['bq'])[:, None, :]
    kv_in = jnp.concatenate([xr[:, None, :], X_p], axis=1)
    K = kv_in @ p['wk'] + p['bk']
    V = kv_in @ p['wv'] + p['bv']
    scores = jnp.einsum('bqd,bkd->bqk', Q, K) / math.sqrt(l)
    probs = jax.nn.softmax(scores, axis=-1)
    z = jnp.einsum('bqk,bkd->bqd', probs, V)[:, 0]

    def ln(x):
        mu = x.mean(-1, keepdims=True)
        var = ((x - mu) ** 2).mean(-1, keepdims=True)
        return (x - mu) / jnp.sqrt(var + 1e-5) * p['gamma'] + p['beta']

    e1 = xt + ln(z)
    h1 = jnp.maximum(ln(e1) @ p['w1'] + p['b1'], 0.0)
    return e1 + (h1 @ p['w2'] + p['b2'])


def make_params(key, c, d):
    ks = jax.random.split(key, 12)
    n = lambda k, shape, s=0.1: (s * jax.random.normal(k, shape)).astype(jnp.float32)
    return {
        # weights stored pre-transposed (in, out) so forward does x @ W
        'wp': n(ks[0], (c, d)), 'bp': n(ks[1], (1, d)),
        'x_r': n(ks[2], (1, d), 1.0),
        'wq': n(ks[3], (d, d)), 'bq': n(ks[4], (1, d)),
        'wk': n(ks[5], (d, d)), 'bk': n(ks[6], (1, d)),
        'wv': n(ks[7], (d, d)), 'bv': n(ks[8], (1, d)),
        'gamma': jnp.ones((1, d), jnp.float32),
        'beta': jnp.zeros((1, d), jnp.float32),
        'w1': n(ks[9], (d, d)), 'b1': n(ks[10], (1, d)),
        'w2': n(ks[11], (d, d)), 'b2': jnp.zeros((1, d), jnp.float32),
    }


if __name__ == "__main__":
    key = jax.random.PRNGKey(0)
    k_y, k_xt, k_p = jax.random.split(key, 3)

    B, N, C, D, H, L = 16, 8, 4, 32, 4, 32   # small synthetic shapes
    Y = jax.random.normal(k_y, (B, N, C), dtype=jnp.float32)
    x_t = jax.random.normal(k_xt, (1, D), dtype=jnp.float32)
    params = make_params(k_p, C, D)
    fused = fuse_params(params, L)           # one-time offline packing/fusion

    ref = jax.block_until_ready(ica_reference(Y, x_t, params, L))

    # Strict numerics check: f32 matmul operands (approx-EUP reciprocal and
    # offline weight-fusion reorders are the only deviations).
    out_f32 = jax.block_until_ready(ica_forward(Y, x_t, fused, mxu_dtype=jnp.float32))
    assert out_f32.shape == (B, D)
    assert jnp.allclose(out_f32, ref, atol=2e-3, rtol=2e-3)

    # Production dtype (default): bf16 matmul operands, f32 accumulation and
    # f32 elementwise/LN/softmax (v5e-safe; MXU-native on v6e/v7x).
    out_bf16 = jax.block_until_ready(ica_forward(Y, x_t, fused))
    assert out_bf16.shape == (B, D)
    assert jnp.allclose(out_bf16, ref, atol=5e-2, rtol=5e-2)

    print("KERNEL_OK")
</pallas_src>

<mosaic_0001>
module attributes {stable_mosaic.version = 11 : i64} {
  func.func @ica_kernel(%arg0: i32, %arg1: memref<16x32xf32, #tpu.memory_space<vmem>>, %arg2: memref<8x32xf32, #tpu.memory_space<vmem>>, %arg3: memref<32x8xf32, #tpu.memory_space<vmem>>, %arg4: memref<32x32xf32, #tpu.memory_space<vmem>>, %arg5: memref<2x32x32xf32, #tpu.memory_space<vmem>>, %arg6: memref<16x32xf32, #tpu.memory_space<vmem>>) attributes {dimension_semantics = [#tpu.dimension_semantics<parallel>], iteration_bounds = array<i64: 1>, scalar_prefetch = 0 : i64, scratch_operands = 0 : i64, tpu.core_type = #tpu.core_type<tc>, window_params = [{transform_indices = @transform_0, window_bounds = array<i64: 16, 32>}, {pipeline_mode = #tpu.pipeline_mode<synchronous>, transform_indices = @transform_1, window_bounds = array<i64: 8, 32>}, {pipeline_mode = #tpu.pipeline_mode<synchronous>, transform_indices = @transform_2, window_bounds = array<i64: 32, 8>}, {pipeline_mode = #tpu.pipeline_mode<synchronous>, transform_indices = @transform_3, window_bounds = array<i64: 32, 32>}, {pipeline_mode = #tpu.pipeline_mode<synchronous>, transform_indices = @transform_4, window_bounds = array<i64: 2, 32, 32>}, {transform_indices = @transform_5, window_bounds = array<i64: 16, 32>}]} {
    %c0 = arith.constant 0 : index
    %c0_0 = arith.constant 0 : index
    %0 = vector.load %arg2[%c0, %c0_0] : memref<8x32xf32, #tpu.memory_space<vmem>>, vector<8x32xf32>
    %1 = vector.extract_strided_slice %0 {offsets = [0, 0], sizes = [1, 32], strides = [1, 1]} : vector<8x32xf32> to vector<1x32xf32>
    %2 = vector.extract_strided_slice %0 {offsets = [1, 0], sizes = [1, 32], strides = [1, 1]} : vector<8x32xf32> to vector<1x32xf32>
    %3 = vector.extract_strided_slice %0 {offsets = [2, 0], sizes = [1, 32], strides = [1, 1]} : vector<8x32xf32> to vector<1x32xf32>
    %4 = vector.extract_strided_slice %0 {offsets = [3, 0], sizes = [1, 32], strides = [1, 1]} : vector<8x32xf32> to vector<1x32xf32>
    %5 = vector.extract_strided_slice %0 {offsets = [4, 0], sizes = [1, 32], strides = [1, 1]} : vector<8x32xf32> to vector<1x32xf32>
    %6 = vector.extract_strided_slice %0 {offsets = [5, 0], sizes = [1, 32], strides = [1, 1]} : vector<8x32xf32> to vector<1x32xf32>
    %7 = vector.extract_strided_slice %0 {offsets = [6, 0], sizes = [1, 32], strides = [1, 1]} : vector<8x32xf32> to vector<1x32xf32>
    %8 = vector.extract_strided_slice %0 {offsets = [7, 0], sizes = [1, 1], strides = [1, 1]} : vector<8x32xf32> to vector<1x1xf32>
    %c0_1 = arith.constant 0 : index
    %c0_2 = arith.constant 0 : index
    %9 = vector.load %arg1[%c0_1, %c0_2] : memref<16x32xf32, #tpu.memory_space<vmem>>, vector<16x32xf32>
    %c0_3 = arith.constant 0 : index
    %c0_4 = arith.constant 0 : index
    %10 = vector.load %arg3[%c0_3, %c0_4] : memref<32x8xf32, #tpu.memory_space<vmem>>, vector<32x8xf32>
    %cst = arith.constant dense<0.000000e+00> : vector<16x8xf32>
    %11 = tpu.matmul %9, %10, %cst {dimension_numbers = #tpu.dot_dimension_numbers<[1], [0], [0], [1], [0, 0, 1, 1], [], []>} : vector<16x32xf32>, vector<32x8xf32>, vector<16x8xf32> -> vector<16x8xf32>
    %cst_5 = arith.constant dense<0xFF800000> : vector<16xf32>
    %12 = vector.multi_reduction <maximumf>, %11, %cst_5 [1] : vector<16x8xf32> to vector<16xf32>
    %13 = vector.shape_cast %12 : vector<16xf32> to vector<16x1xf32>
    %14 = vector.broadcast %8 : vector<1x1xf32> to vector<16x1xf32>
    %15 = arith.maximumf %13, %14 : vector<16x1xf32>
    %16 = vector.broadcast %15 : vector<16x1xf32> to vector<16x8xf32>
    %17 = arith.subf %11, %16 : vector<16x8xf32>
    %18 = math.exp %17 : vector<16x8xf32>
    %19 = vector.broadcast %8 : vector<1x1xf32> to vector<16x1xf32>
    %20 = arith.subf %19, %15 : vector<16x1xf32>
    %21 = math.exp %20 : vector<16x1xf32>
    %cst_6 = arith.constant dense<0.000000e+00> : vector<16xf32>
    %22 = vector.multi_reduction <add>, %18, %cst_6 [1] : vector<16x8xf32> to vector<16xf32>
    %23 = vector.shape_cast %22 : vector<16xf32> to vector<16x1xf32>
    %24 = arith.addf %23, %21 : vector<16x1xf32>
    %25 = tpu.reciprocal %24 {approx = true} : vector<16x1xf32> -> vector<16x1xf32>
    %26 = vector.broadcast %25 : vector<16x1xf32> to vector<16x8xf32>
    %27 = arith.mulf %18, %26 : vector<16x8xf32>
    %28 = arith.mulf %21, %25 : vector<16x1xf32>
    %29 = tpu.iota {dimensions = array<i32: 0>} : vector<8x32xi32>
    %30 = tpu.iota {dimensions = array<i32: 1>} : vector<8x32xi32>
    %c4_i32 = arith.constant 4 : i32
    %31 = vector.broadcast %c4_i32 : i32 to vector<8x32xi32>
    %32 = arith.muli %29, %31 : vector<8x32xi32>
    %33 = arith.cmpi sge, %30, %32 : vector<8x32xi32>
    %c4_i32_7 = arith.constant 4 : i32
    %34 = vector.broadcast %c4_i32_7 : i32 to vector<8x32xi32>
    %35 = arith.muli %29, %34 : vector<8x32xi32>
    %c4_i32_8 = arith.constant 4 : i32
    %36 = vector.broadcast %c4_i32_8 : i32 to vector<8x32xi32>
    %37 = arith.addi %35, %36 : vector<8x32xi32>
    %38 = arith.cmpi slt, %30, %37 : vector<8x32xi32>
    %39 = arith.andi %33, %38 : vector<8x32xi1>
    %cst_9 = arith.constant 1.000000e+00 : f32
    %cst_10 = arith.constant 0.000000e+00 : f32
    %40 = vector.broadcast %cst_9 : f32 to vector<8x32xf32>
    %41 = vector.broadcast %cst_10 : f32 to vector<8x32xf32>
    %42 = arith.select %39, %40, %41 : vector<8x32xi1>, vector<8x32xf32>
    %cst_11 = arith.constant dense<0.000000e+00> : vector<16x32xf32>
    %43 = tpu.matmul %27, %42, %cst_11 {dimension_numbers = #tpu.dot_dimension_numbers<[1], [0], [0], [1], [0, 0, 1, 1], [], []>} : vector<16x8xf32>, vector<8x32xf32>, vector<16x32xf32> -> vector<16x32xf32>
    %44 = arith.mulf %43, %9 : vector<16x32xf32>
    %c0_12 = arith.constant 0 : index
    %c0_13 = arith.constant 0 : index
    %45 = vector.load %arg4[%c0_12, %c0_13] : memref<32x32xf32, #tpu.memory_space<vmem>>, vector<32x32xf32>
    %cst_14 = arith.constant dense<0.000000e+00> : vector<16x32xf32>
    %46 = tpu.matmul %44, %45, %cst_14 {dimension_numbers = #tpu.dot_dimension_numbers<[1], [0], [0], [1], [0, 0, 1, 1], [], []>} : vector<16x32xf32>, vector<32x32xf32>, vector<16x32xf32> -> vector<16x32xf32>
    %47 = vector.broadcast %3 : vector<1x32xf32> to vector<16x32xf32>
    %48 = arith.addf %46, %47 : vector<16x32xf32>
    %49 = vector.broadcast %28 : vector<16x1xf32> to vector<16x32xf32>
    %50 = vector.broadcast %2 : vector<1x32xf32> to vector<16x32xf32>
    %51 = arith.mulf %49, %50 : vector<16x32xf32>
    %52 = arith.addf %48, %51 : vector<16x32xf32>
    %cst_15 = arith.constant dense<0.000000e+00> : vector<16xf32>
    %53 = vector.multi_reduction <add>, %52, %cst_15 [1] : vector<16x32xf32> to vector<16xf32>
    %54 = vector.shape_cast %53 : vector<16xf32> to vector<16x1xf32>
    %cst_16 = arith.constant 3.200000e+01 : f32
    %55 = vector.broadcast %cst_16 : f32 to vector<16x1xf32>
    %56 = arith.divf %54, %55 : vector<16x1xf32>
    %57 = vector.broadcast %56 : vector<16x1xf32> to vector<16x32xf32>
    %58 = arith.subf %52, %57 : vector<16x32xf32>
    %59 = arith.mulf %58, %58 : vector<16x32xf32>
    %cst_17 = arith.constant dense<0.000000e+00> : vector<16xf32>
    %60 = vector.multi_reduction <add>, %59, %cst_17 [1] : vector<16x32xf32> to vector<16xf32>
    %61 = vector.shape_cast %60 : vector<16xf32> to vector<16x1xf32>
    %cst_18 = arith.constant 3.200000e+01 : f32
    %62 = vector.broadcast %cst_18 : f32 to vector<16x1xf32>
    %63 = arith.divf %61, %62 : vector<16x1xf32>
    %64 = vector.broadcast %56 : vector<16x1xf32> to vector<16x32xf32>
    %65 = arith.subf %52, %64 : vector<16x32xf32>
    %cst_19 = arith.constant 9.99999974E-6 : f32
    %66 = vector.broadcast %cst_19 : f32 to vector<16x1xf32>
    %67 = arith.addf %63, %66 : vector<16x1xf32>
    %68 = math.rsqrt %67 : vector<16x1xf32>
    %69 = vector.broadcast %68 : vector<16x1xf32> to vector<16x32xf32>
    %70 = arith.mulf %65, %69 : vector<16x32xf32>
    %71 = vector.broadcast %4 : vector<1x32xf32> to vector<16x32xf32>
    %72 = arith.mulf %70, %71 : vector<16x32xf32>
    %73 = vector.broadcast %5 : vector<1x32xf32> to vector<16x32xf32>
    %74 = arith.addf %72, %73 : vector<16x32xf32>
    %75 = vector.broadcast %1 : vector<1x32xf32> to vector<16x32xf32>
    %76 = arith.addf %75, %74 : vector<16x32xf32>
    %cst_20 = arith.constant dense<0.000000e+00> : vector<16xf32>
    %77 = vector.multi_reduction <add>, %76, %cst_20 [1] : vector<16x32xf32> to vector<16xf32>
    %78 = vector.shape_cast %77 : vector<16xf32> to vector<16x1xf32>
    %cst_21 = arith.constant 3.200000e+01 : f32
    %79 = vector.broadcast %cst_21 : f32 to vector<16x1xf32>
    %80 = arith.divf %78, %79 : vector<16x1xf32>
    %81 = vector.broadcast %80 : vector<16x1xf32> to vector<16x32xf32>
    %82 = arith.subf %76, %81 : vector<16x32xf32>
    %83 = arith.mulf %82, %82 : vector<16x32xf32>
    %cst_22 = arith.constant dense<0.000000e+00> : vector<16xf32>
    %84 = vector.multi_reduction <add>, %83, %cst_22 [1] : vector<16x32xf32> to vector<16xf32>
    %85 = vector.shape_cast %84 : vector<16xf32> to vector<16x1xf32>
    %cst_23 = arith.constant 3.200000e+01 : f32
    %86 = vector.broadcast %cst_23 : f32 to vector<16x1xf32>
    %87 = arith.divf %85, %86 : vector<16x1xf32>
    %88 = vector.broadcast %80 : vector<16x1xf32> to vector<16x32xf32>
    %89 = arith.subf %76, %88 : vector<16x32xf32>
    %cst_24 = arith.constant 9.99999974E-6 : f32
    %90 = vector.broadcast %cst_24 : f32 to vector<16x1xf32>
    %91 = arith.addf %87, %90 : vector<16x1xf32>
    %92 = math.rsqrt %91 : vector<16x1xf32>
    %93 = vector.broadcast %92 : vector<16x1xf32> to vector<16x32xf32>
    %94 = arith.mulf %89, %93 : vector<16x32xf32>
    %95 = vector.broadcast %4 : vector<1x32xf32> to vector<16x32xf32>
    %96 = arith.mulf %94, %95 : vector<16x32xf32>
    %97 = vector.broadcast %5 : vector<1x32xf32> to vector<16x32xf32>
    %98 = arith.addf %96, %97 : vector<16x32xf32>
    %c0_25 = arith.constant 0 : index
    %c0_26 = arith.constant 0 : index
    %c0_27 = arith.constant 0 : index
    %99 = vector.load %arg5[%c0_25, %c0_26, %c0_27] : memref<2x32x32xf32, #tpu.memory_space<vmem>>, vector<1x32x32xf32>
    %100 = vector.shape_cast %99 : vector<1x32x32xf32> to vector<32x32xf32>
    %cst_28 = arith.constant dense<0.000000e+00> : vector<16x32xf32>
    %101 = tpu.matmul %98, %100, %cst_28 {dimension_numbers = #tpu.dot_dimension_numbers<[1], [0], [0], [1], [0, 0, 1, 1], [], []>} : vector<16x32xf32>, vector<32x32xf32>, vector<16x32xf32> -> vector<16x32xf32>
    %102 = vector.broadcast %6 : vector<1x32xf32> to vector<16x32xf32>
    %103 = arith.addf %101, %102 : vector<16x32xf32>
    %cst_29 = arith.constant 0.000000e+00 : f32
    %104 = vector.broadcast %cst_29 : f32 to vector<16x32xf32>
    %105 = arith.maximumf %103, %104 : vector<16x32xf32>
    %c1 = arith.constant 1 : index
    %c0_30 = arith.constant 0 : index
    %c0_31 = arith.constant 0 : index
    %106 = vector.load %arg5[%c1, %c0_30, %c0_31] : memref<2x32x32xf32, #tpu.memory_space<vmem>>, vector<1x32x32xf32>
    %107 = vector.shape_cast %106 : vector<1x32x32xf32> to vector<32x32xf32>
    %cst_32 = arith.constant dense<0.000000e+00> : vector<16x32xf32>
    %108 = tpu.matmul %105, %107, %cst_32 {dimension_numbers = #tpu.dot_dimension_numbers<[1], [0], [0], [1], [0, 0, 1, 1], [], []>} : vector<16x32xf32>, vector<32x32xf32>, vector<16x32xf32> -> vector<16x32xf32>
    %109 = vector.broadcast %7 : vector<1x32xf32> to vector<16x32xf32>
    %110 = arith.addf %108, %109 : vector<16x32xf32>
    %111 = arith.addf %76, %110 : vector<16x32xf32>
    %c0_33 = arith.constant 0 : index
    %c0_34 = arith.constant 0 : index
    %112 = vector.load %arg6[%c0_33, %c0_34] : memref<16x32xf32, #tpu.memory_space<vmem>>, vector<16x32xf32>
    tpu.vector_store %arg6[%c0_33, %c0_34], %111 {strides = array<i32>} : memref<16x32xf32, #tpu.memory_space<vmem>>, vector<16x32xf32>,
    return
  }
  func.func @transform_0(%arg0: i32) -> (i32, i32) {
    %c0_i32 = arith.constant 0 : i32
    %c0_i32_0 = arith.constant 0 : i32
    return %arg0, %c0_i32 : i32, i32
  }
  func.func @transform_1(%arg0: i32) -> (i32, i32) {
    %c0_i32 = arith.constant 0 : i32
    %c0_i32_0 = arith.constant 0 : i32
    %c0_i32_1 = arith.constant 0 : i32
    return %c0_i32, %c0_i32_0 : i32, i32
  }
  func.func @transform_2(%arg0: i32) -> (i32, i32) {
    %c0_i32 = arith.constant 0 : i32
    %c0_i32_0 = arith.constant 0 : i32
    %c0_i32_1 = arith.constant 0 : i32
    return %c0_i32, %c0_i32_0 : i32, i32
  }
  func.func @transform_3(%arg0: i32) -> (i32, i32) {
    %c0_i32 = arith.constant 0 : i32
    %c0_i32_0 = arith.constant 0 : i32
    %c0_i32_1 = arith.constant 0 : i32
    return %c0_i32, %c0_i32_0 : i32, i32
  }
  func.func @transform_4(%arg0: i32) -> (i32, i32, i32) {
    %c0_i32 = arith.constant 0 : i32
    %c0_i32_0 = arith.constant 0 : i32
    %c0_i32_1 = arith.constant 0 : i32
    %c0_i32_2 = arith.constant 0 : i32
    return %c0_i32, %c0_i32_0, %c0_i32_1 : i32, i32, i32
  }
  func.func @transform_5(%arg0: i32) -> (i32, i32) {
    %c0_i32 = arith.constant 0 : i32
    %c0_i32_0 = arith.constant 0 : i32
    return %arg0, %c0_i32 : i32, i32
  }
}

</mosaic_0001>

<bundles_post_ra>
// kernel: tpu_custom_call.1
= control target key start
LH: loop header
LB: loop body
LE: loop exit
PB: predicated region body
PF: predicated region fallthrough
CT: control target
= control target key end

     0   :  { %10 = vsyncpa [#allocation3], 0  ;;  %s1072_s0 = inlined_call_operand.vmem [shape: f32[16,32], index: 0, kind: input, shape index: {}]   ;;  %s1073_s1 = inlined_call_operand.hbm [shape: f32[8,32], index: 1, kind: input, shape index: {}]   ;;  %s1074_s2 = inlined_call_operand.vmem [shape: f32[32,8], index: 2, kind: input, shape index: {}]   ;;  %s1075_s3 = inlined_call_operand.vmem [shape: f32[32,32], index: 3, kind: input, shape index: {}]   ;;  %s1076_s4 = inlined_call_operand.hbm [shape: f32[2,32,32], index: 4, kind: input, shape index: {}]   ;;  %s1077_s5 = inlined_call_operand.hbm [shape: f32[16,32], index: 5, kind: output, shape index: {}]  }
   0x1   :  { %11 = vsyncpa [#allocation6], 0 }
   0x2   :  { %12 = vsyncpa [#allocation4], 0  ;;  %s893_s18 = smov [#allocation2]   ;;  %s894_s20 = smov [#allocation5]  }
   0x3   :  { %s21_s19 = sshll.u32 %s893_s18, 4  ;;  %s34_s21 = sshll.u32 %s894_s20, 4  ;;  %s22_s19 = int_to_ptr.vmem [resolvable:$true] %s21_s19  ;;  %s930_s21 = int_to_ptr.vmem [resolvable:$true] %s34_s21 }
   0x4   :  { %s821_s24 = scalar_lea.hbm %s1073_s1, 128 }
   0x5   :  { %p822_p0 = scmp.ne.s32.totalorder %s1073_s1, %s821_s24  ;;  %p825_p1 = scmp.lt.u32.totalorder %s821_s24, %s1073_s1 }
   0x7   :  { %p827_p2 = pnand %p825_p1, %p822_p0 }
   0x9   :  { %830 = shalt.err (!%p827_p2)
}
   0xa   :  { %s831_s29 = scalar_lea.vmem %s22_s19, 128  ;;  %p836_p4 = scmp.lt.s32.totalorder %s22_s19, %s22_s19 }
   0xb   :  { %p832_p3 = scmp.ne.s32.totalorder %s22_s19, %s831_s29  ;;  %p837_p5 = scmp.lt.s32.totalorder %s831_s29, %s831_s29 }
   0xd   :  { %p838_p6 = por %p837_p5, %p836_p4 }
   0xf   :  { %p839_p7 = pnand %p838_p6, %p832_p3 }
  0x11   :  { %842 = shalt.err (!%p839_p7)
}
  0x12   :  { %24 = dma.hbm_to_vmem [thread:$0]  %s1073_s1, 128, %s22_s19, [#allocation3]  }
  0x13   :  { %s843_s9 = scalar_lea.hbm %s1076_s4, 1024 }
  0x14   :  { %p844_p8 = scmp.ne.s32.totalorder %s1076_s4, %s843_s9  ;;  %p847_p9 = scmp.lt.u32.totalorder %s843_s9, %s1076_s4 }
  0x16   :  { %p849_p10 = pnand %p847_p9, %p844_p8 }
  0x18   :  { %852 = shalt.err (!%p849_p10)
}
  0x19   :  { %s853_s14 = scalar_lea.vmem %s930_s21, 1024  ;;  %p858_p12 = scmp.lt.s32.totalorder %s930_s21, %s930_s21 }
  0x1a   :  { %p854_p11 = scmp.ne.s32.totalorder %s930_s21, %s853_s14  ;;  %p859_p13 = scmp.lt.s32.totalorder %s853_s14, %s853_s14 }
  0x1c   :  { %p860_p0 = por %p859_p13, %p858_p12 }
  0x1e   :  { %p861_p1 = pnand %p860_p0, %p854_p11 }
  0x20   :  { %864 = shalt.err (!%p861_p1)
}
  0x21   :  { %s895_s1 = smov 128   ;;  %s896_s15 = smov 8  }
  0x22   :  { %40 = dma.hbm_to_vmem [thread:$0]  %s1076_s4, 1024, %s930_s21, [#allocation6], %s895_s1, %s895_s1, %s896_s15  }
  0x23   :  { %887 = dma.done.wait [#allocation3], 128  }
  0x24   :  { %888 = vsyncadd [#allocation3], 4294967168 }
  0x25   :  { %889 = dma.done.wait [#allocation6], 1024  }
  0x26   :  { %890 = vsyncadd [#allocation6], 4294966272  ;;  %vm54_vm0 = vcmask 261120   ;;  %v50_v0 = vld [vmem:[%s1074_s2] sm:$0xff]  ;;  %v51_v1 = vld [vmem:[%s1074_s2 + $0x8] sm:$0xff]  ;;  %vm136_vm1 = vcmask 64512   ;;  %v143_v13 = vlaneseq }
  0x27   :  { %v52_v2 = vld [vmem:[%s1074_s2 + $0x10] sm:$0xff]  ;;  %v760_v3 = vpack.c.bf16 %v51_v1, %v50_v0  ;;  %v53_v4 = vld [vmem:[%s1074_s2 + $0x18] sm:$0xff]  ;;  %v979_v5 = vld [vmem:[%s1072_s0] sm:$0xff]  ;;  %v897_v12 = vmov 0   ;;  %v898_v48 = vmov 1.0  }
  0x28   :  { %v764_v6 = vpack.c.bf16 %v53_v4, %v52_v2  ;;  %719 = vmatprep.mubr.msk.f32.mxu0 %vm54_vm0, %v979_v5  ;;  %v986_v7 = vld [vmem:[%s1072_s0 + $0x8] sm:$0xff]  ;;  %799 = vset.pattern.permute.xlu1 %v897_v12  ;;  %v992_v14 = vshrl.u32 %v143_v13, 7  ;;  %v995_v16 = vld [vmem:[#allocation2] sm:$0xff]  ;;  %v198_v44 = vand.u32 127, %v143_v13  ;;  %v290_v57 = vld [vmem:[%s1075_s3 + $0x10] sm:$0xff] }
  0x29   :  { %761 = vmatprep.subr.bf16.mxu0 %v760_v3  ;;  %800 = vset.pattern.permute.xlu0 %v897_v12  ;;  %v288_v50 = vld [vmem:[%s1075_s3] sm:$0xff]  ;;  %v289_v51 = vld [vmem:[%s1075_s3 + $0x8] sm:$0xff]  ;;  %v291_v58 = vld [vmem:[%s1075_s3 + $0x18] sm:$0xff]  ;;  %s899_s3 = smov [#allocation7]  }
  0x2a   :  { %763 = vmatpush3.bf16.msra.mxu0 %v760_v3  ;;  %v145_v15 = vsub.s32 7, %v992_v14  ;;  %v199_v42 = vmul.u32 4, %v992_v14  ;;  %v768_v52 = vpack.c.bf16 %v289_v51, %v288_v50  ;;  %v772_v59 = vpack.c.bf16 %v291_v58, %v290_v57  ;;  %s660_s10 = sshll.u32 %s899_s3, 4  ;;  %s661_s10 = int_to_ptr.vmem [resolvable:$true] %s660_s10 }
  0x2b   :  { %765 = vmatprep.subr.bf16.mxu0 %v764_v6  ;;  %v294_v1 = vsub.s32 2, %v992_v14  ;;  %v389_v2 = vsub.s32 1, %v992_v14  ;;  %s865_s11 = scalar_lea.vmem %s661_s10, 256  ;;  %p870_p3 = scmp.lt.s32.totalorder %s661_s10, %s661_s10 }
  0x2c   :  { %v146_v17 = vrot.slane %v995_v16, %v145_v15  ;;  %v201_v45 = vadd.s32 4, %v199_v42  ;;  %vm200_vm2 = vcmp.ge.s32.totalorder %v198_v44, %v199_v42  ;;  %p866_p2 = scmp.ne.s32.totalorder %s661_s10, %s865_s11  ;;  %p871_p4 = scmp.lt.s32.totalorder %s865_s11, %s865_s11 }
  0x2d   :  { %v295_v3 = vrot.slane %v995_v16, %v294_v1  ;;  %v390_v4 = vrot.slane %v995_v16, %v389_v2  ;;  %v472_v1 = vld [vmem:[#allocation5 + $0x10] sm:$0xff]  ;;  %v473_v2 = vld [vmem:[#allocation5 + $0x18] sm:$0xff] }
  0x2e   :  { %767 = vmatpush3.bf16.msra.mxu0 %v764_v6  ;;  %vm202_vm3 = vcmp.lt.s32.totalorder %v198_v44, %v201_v45  ;;  %p872_p5 = por %p871_p4, %p870_p3 }
  0x2f   :  { %vm203_vm4 = vmand %vm200_vm2, %vm202_vm3 }
  0x30   :  { %722 = vmatprep.subr.msk.mxu1 %vm203_vm4, %v898_v48  ;;  %p873_p6 = pnand %p872_p5, %p866_p2 }
  0x31   :  { %720 = vmatmul.mubr.msk.f32.vlgmr.msra.gmra.mrb[0].mxu0 %vm54_vm0, %v986_v7  ;;  %723 = vmatpush3.msk.msra.mxu1 %vm203_vm4, %v898_v48 }
  0x32   :  { %769 = vmatprep.subr.bf16.mxu1 %v768_v52 }
 0x104   :  { %v721_v8 = vpop.f32.mrb[0].mxu0 }
 0x105   :  { %v127_v9 = vpop.f32.mrb[1].mxu0  ;;  %v140_v11 = vsel %vm136_vm1, %v721_v8, -inf }
 0x106   :  { %v137_v10 = vsel %vm136_vm1, %v127_v9, -inf }
 0x107   :  { %138 = vmax.xlane.f32.xlu0 %v137_v10 }
 0x10b   :  { %141 = vmax.xlane.f32.xlu0 %v140_v11 }
 0x194   :  { %v139_v18 = vpop.xlane.xlu0 %138 }
 0x195   :  { %v147_v19 = vmax.f32 %v139_v18, %v146_v17 }
 0x197   :  { %v165_v20 = vsub.f32 %v146_v17, %v147_v19  ;;  %151 = vperm.xlu1 %799, %v147_v19  }
 0x198   :  { %v142_v21 = vpop.xlane.xlu0 %141 }
 0x199   :  { %v148_v22 = vmax.f32 %v142_v21, %v146_v17  ;;  %v167_v34 = vmul.f32 1.442695, %v165_v20 }
 0x19b   :  { %v166_v23 = vsub.f32 %v146_v17, %v148_v22  ;;  %156 = vperm.xlu1 %799, %v148_v22  }
 0x19d   :  { %v169_v35 = vmul.f32 1.442695, %v166_v23 }
 0x216   :  { %v152_v24 = vpop.permute.xlu1 %151 }
 0x217   :  { %v159_v25 = vsub.f32 %v127_v9, %v152_v24 }
 0x219   :  { %v161_v26 = vmul.f32 1.442695, %v159_v25 }
 0x21a   :  { %v157_v27 = vpop.permute.xlu1 %156 }
 0x21b   :  { %801 = vpow2.f32 %v161_v26  ;;  %v160_v28 = vsub.f32 %v721_v8, %v157_v27 }
 0x21d   :  { %v163_v29 = vmul.f32 1.442695, %v160_v28 }
 0x21f   :  { %803 = vpow2.f32 %v163_v29 }
 0x220   :  { %805 = vpow2.f32 %v167_v34  ;;  %v424_v34 = vsub.s32 3, %v992_v14 }
 0x221   :  { %807 = vpow2.f32 %v169_v35  ;;  %v430_v35 = vsub.s32 4, %v992_v14 }
 0x225   :  { %v802_v30 = vpop.eup %801 }
 0x226   :  { %v171_v31 = vsel %vm136_vm1, %v802_v30, 0.0 }
 0x227   :  { %172 = vadd.xlane.f32.xlu0 %v171_v31 }
 0x229   :  { %v804_v32 = vpop.eup %803 }
 0x22a   :  { %v174_v33 = vsel %vm136_vm1, %v804_v32, 0.0  ;;  %v806_v36 = vpop.eup %805 }
 0x22b   :  { %175 = vadd.xlane.f32.xlu1 %v174_v33  ;;  %v808_v39 = vpop.eup %807 }
 0x2b4   :  { %v173_v37 = vpop.xlane.xlu0 %172 }
 0x2b5   :  { %v177_v38 = vadd.f32 %v806_v36, %v173_v37  ;;  %v436_v37 = vsub.s32 0, %v992_v14 }
 0x2b7   :  { %809 = vrcp.f32 %v177_v38  ;;  %v437_v44 = vrot.slane %v995_v16, %v436_v37 }
 0x2b8   :  { %v176_v40 = vpop.xlane.xlu1 %175 }
 0x2b9   :  { %v178_v41 = vadd.f32 %v808_v39, %v176_v40 }
 0x2bb   :  { %811 = vrcp.f32 %v178_v41  ;;  %v431_v41 = vrot.slane %v995_v16, %v430_v35 }
 0x2c1   :  { %v810_v43 = vpop.eup %809 }
 0x2c2   :  { %183 = vperm.xlu0 %800, %v810_v43   ;;  %v193_v46 = vmul.f32 %v810_v43, %v806_v36  ;;  %v425_v36 = vrot.slane %v995_v16, %v424_v34  ;;  %v568_v34 = vsub.s32 6, %v992_v14 }
 0x2c4   :  { %v569_v35 = vrot.slane %v995_v16, %v568_v34 }
 0x2c5   :  { %v812_v47 = vpop.eup %811 }
 0x2c6   :  { %188 = vperm.xlu1 %799, %v812_v47   ;;  %379 = vperm.xlu0 %800, %v193_v46   ;;  %v194_v49 = vmul.f32 %v812_v47, %v808_v39 }
 0x2ca   :  { %384 = vperm.xlu0 %800, %v194_v49  }
 0x341   :  { %v184_v53 = vpop.permute.xlu0 %183 }
 0x342   :  { %v191_v54 = vmul.f32 %v802_v30, %v184_v53 }
 0x344   :  { %724 = vmatprep.mubr.msk.f32.mxu1 %vm136_vm1, %v191_v54 }
 0x345   :  { %v189_v55 = vpop.permute.xlu1 %188  ;;  %v380_v0 = vpop.permute.xlu0 %379 }
 0x346   :  { %v192_v56 = vmul.f32 %v804_v32, %v189_v55  ;;  %v391_v11 = vmul.f32 %v390_v4, %v380_v0 }
 0x348   :  { %725 = vmatmul.mubr.msk.f32.vlgmr.msra.gmra.mrb[0].mxu1 %vm136_vm1, %v192_v56 }
 0x349   :  { %771 = vmatpush3.bf16.msra.mxu1 %v768_v52  ;;  %v385_v6 = vpop.permute.xlu0 %384 }
 0x34a   :  { %773 = vmatprep.subr.bf16.mxu1 %v772_v59  ;;  %v392_v9 = vmul.f32 %v390_v4, %v385_v6  ;;  %v562_v4 = vld [vmem:[#allocation5 + $0x20] sm:$0xff]  ;;  %v563_v6 = vld [vmem:[#allocation5 + $0x28] sm:$0xff] }
 0x34d   :  { %775 = vmatpush3.bf16.msra.mxu1 %v772_v59 }
 0x41b   :  { %v726_v60 = vpop.f32.mrb[0].mxu1 }
 0x41c   :  { %v277_v61 = vpop.f32.mrb[1].mxu1  ;;  %v287_v63 = vmul.f32 %v726_v60, %v986_v7 }
 0x41d   :  { %v286_v62 = vmul.f32 %v277_v61, %v979_v5 }
 0x41f   :  { %735 = vmatprep.mubr.msk.f32.mxu1 %vm54_vm0, %v286_v62  ;;  %v470_v62 = vld [vmem:[#allocation5] sm:$0xff] }
 0x420   :  { %736 = vmatmul.mubr.msk.f32.vlgmr.msra.gmra.mrb[2].mxu1 %vm54_vm0, %v287_v63  ;;  %v471_v63 = vld [vmem:[#allocation5 + $0x8] sm:$0xff] }
 0x421   :  { %v776_v0 = vpack.c.bf16 %v471_v63, %v470_v62 }
 0x423   :  { %777 = vmatprep.subr.bf16.mxu0 %v776_v0 }
 0x424   :  { %779 = vmatpush3.bf16.msra.mxu0 %v776_v0 }
 0x4f3   :  { %v737_v8 = vpop.f32.mrb[2].mxu1 }
 0x4f4   :  { %v374_v10 = vadd.f32 %v737_v8, %v295_v3  ;;  %v368_v5 = vpop.f32.mrb[3].mxu1  ;;  %v784_v8 = vpack.c.bf16 %v563_v6, %v562_v4 }
 0x4f5   :  { %v369_v7 = vadd.f32 %v368_v5, %v295_v3  ;;  %v780_v3 = vpack.c.bf16 %v473_v2, %v472_v1 }
 0x4f6   :  { %v394_v12 = vadd.f32 %v392_v9, %v374_v10  ;;  %785 = vmatprep.subr.bf16.mxu1 %v784_v8 }
 0x4f7   :  { %v393_v13 = vadd.f32 %v391_v11, %v369_v7  ;;  %781 = vmatprep.subr.bf16.mxu0 %v780_v3  ;;  %787 = vmatpush3.bf16.msra.mxu1 %v784_v8 }
 0x4f8   :  { %v398_v15 = vsel %vm54_vm0, %v394_v12, 0.0  ;;  %783 = vmatpush3.bf16.msra.mxu0 %v780_v3 }
 0x4f9   :  { %399 = vadd.xlane.f32.xlu0 %v398_v15  ;;  %v395_v17 = vsel %vm54_vm0, %v393_v13, 0.0 }
 0x4fa   :  { %396 = vadd.xlane.f32.xlu1 %v395_v17 }
 0x586   :  { %v400_v18 = vpop.xlane.xlu0 %399 }
 0x587   :  { %v403_v19 = vmul.f32 0.03125, %v400_v18  ;;  %v397_v20 = vpop.xlane.xlu1 %396 }
 0x588   :  { %v402_v21 = vmul.f32 0.03125, %v397_v20 }
 0x589   :  { %v405_v22 = vsub.f32 %v394_v12, %v403_v19 }
 0x58a   :  { %v404_v23 = vsub.f32 %v393_v13, %v402_v21 }
 0x58b   :  { %v407_v24 = vmul.f32 %v405_v22, %v405_v22 }
 0x58c   :  { %v406_v25 = vmul.f32 %v404_v23, %v404_v23 }
 0x58d   :  { %v411_v26 = vsel %vm54_vm0, %v407_v24, 0.0  ;;  %v565_v24 = vld [vmem:[#allocation5 + $0x38] sm:$0xff] }
 0x58e   :  { %412 = vadd.xlane.f32.xlu1 %v411_v26  ;;  %v408_v27 = vsel %vm54_vm0, %v406_v25, 0.0  ;;  %v476_v26 = vsub.s32 5, %v992_v14 }
 0x58f   :  { %409 = vadd.xlane.f32.xlu0 %v408_v27 }
 0x590   :  { %v477_v27 = vrot.slane %v995_v16, %v476_v26 }
 0x61b   :  { %v413_v28 = vpop.xlane.xlu1 %412 }
 0x61c   :  { %v415_v29 = vmul.f32 0.03125, %v413_v28  ;;  %v410_v30 = vpop.xlane.xlu0 %409 }
 0x61d   :  { %v414_v31 = vmul.f32 0.03125, %v410_v30 }
 0x61e   :  { %v417_v32 = vadd.f32 1e-05, %v415_v29 }
 0x61f   :  { %v416_v33 = vadd.f32 1e-05, %v414_v31 }
 0x620   :  { %813 = vrsqrt.f32 %v417_v32 }
 0x621   :  { %815 = vrsqrt.f32 %v416_v33 }
 0x62a   :  { %v814_v38 = vpop.eup %813 }
 0x62b   :  { %v816_v39 = vpop.eup %815  ;;  %v421_v40 = vmul.f32 %v814_v38, %v405_v22 }
 0x62c   :  { %v420_v42 = vmul.f32 %v816_v39, %v404_v23  ;;  %v564_v23 = vld [vmem:[#allocation5 + $0x30] sm:$0xff] }
 0x62d   :  { %v427_v43 = vmul.f32 %v425_v36, %v421_v40  ;;  %v788_v25 = vpack.c.bf16 %v565_v24, %v564_v23 }
 0x62e   :  { %v426_v45 = vmul.f32 %v425_v36, %v420_v42 }
 0x62f   :  { %v433_v46 = vadd.f32 %v431_v41, %v427_v43  ;;  %789 = vmatprep.subr.bf16.mxu1 %v788_v25 }
 0x630   :  { %v432_v47 = vadd.f32 %v431_v41, %v426_v45  ;;  %791 = vmatpush3.bf16.msra.mxu1 %v788_v25 }
 0x631   :  { %v1033_v48 = vadd.f32 %v437_v44, %v433_v46 }
 0x632   :  { %v1035_v49 = vadd.f32 %v437_v44, %v432_v47 }
 0x633   :  { %v443_v50 = vsel %vm54_vm0, %v1033_v48, 0.0 }
 0x634   :  { %444 = vadd.xlane.f32.xlu1 %v443_v50  ;;  %v440_v51 = vsel %vm54_vm0, %v1035_v49, 0.0 }
 0x635   :  { %441 = vadd.xlane.f32.xlu0 %v440_v51 }
 0x6c1   :  { %v445_v52 = vpop.xlane.xlu1 %444 }
 0x6c2   :  { %v447_v53 = vmul.f32 0.03125, %v445_v52  ;;  %v442_v54 = vpop.xlane.xlu0 %441 }
 0x6c3   :  { %v446_v55 = vmul.f32 0.03125, %v442_v54 }
 0x6c4   :  { %v449_v56 = vsub.f32 %v1033_v48, %v447_v53 }
 0x6c5   :  { %v448_v57 = vsub.f32 %v1035_v49, %v446_v55 }
 0x6c6   :  { %v451_v58 = vmul.f32 %v449_v56, %v449_v56 }
 0x6c7   :  { %v450_v59 = vmul.f32 %v448_v57, %v448_v57 }
 0x6c8   :  { %v455_v60 = vsel %vm54_vm0, %v451_v58, 0.0 }
 0x6c9   :  { %456 = vadd.xlane.f32.xlu1 %v455_v60  ;;  %v452_v61 = vsel %vm54_vm0, %v450_v59, 0.0 }
 0x6ca   :  { %453 = vadd.xlane.f32.xlu0 %v452_v61 }
 0x756   :  { %v457_v9 = vpop.xlane.xlu1 %456 }
 0x757   :  { %v459_v10 = vmul.f32 0.03125, %v457_v9  ;;  %v454_v5 = vpop.xlane.xlu0 %453 }
 0x758   :  { %v458_v11 = vmul.f32 0.03125, %v454_v5 }
 0x759   :  { %v461_v7 = vadd.f32 1e-05, %v459_v10 }
 0x75a   :  { %v460_v12 = vadd.f32 1e-05, %v458_v11 }
 0x75b   :  { %817 = vrsqrt.f32 %v461_v7 }
 0x75c   :  { %819 = vrsqrt.f32 %v460_v12 }
 0x765   :  { %v818_v13 = vpop.eup %817 }
 0x766   :  { %v820_v15 = vpop.eup %819  ;;  %v465_v17 = vmul.f32 %v818_v13, %v449_v56 }
 0x767   :  { %v464_v18 = vmul.f32 %v820_v15, %v448_v57 }
 0x768   :  { %v467_v19 = vmul.f32 %v465_v17, %v425_v36 }
 0x769   :  { %v466_v20 = vmul.f32 %v464_v18, %v425_v36 }
 0x76a   :  { %v469_v22 = vadd.f32 %v467_v19, %v431_v41 }
 0x76b   :  { %v468_v21 = vadd.f32 %v466_v20, %v431_v41 }
 0x76d   :  { %746 = vmatprep.mubr.msk.f32.mxu0 %vm54_vm0, %v468_v21 }
 0x76e   :  { %747 = vmatmul.mubr.msk.f32.vlgmr.msra.gmra.mrb[2].mxu0 %vm54_vm0, %v469_v22 }
 0x841   :  { %v748_v28 = vpop.f32.mrb[2].mxu0 }
 0x842   :  { %v556_v29 = vadd.f32 %v748_v28, %v477_v27  ;;  %v550_v30 = vpop.f32.mrb[3].mxu0 }
 0x843   :  { %v551_v31 = vadd.f32 %v550_v30, %v477_v27 }
 0x844   :  { %v560_v33 = vmax.f32 %v556_v29, 0.0 }
 0x845   :  { %v559_v32 = vmax.f32 %v551_v31, 0.0 }
 0x847   :  { %757 = vmatprep.mubr.msk.f32.mxu1 %vm54_vm0, %v559_v32 }
 0x848   :  { %758 = vmatmul.mubr.msk.f32.vlgmr.msra.gmra.mrb[4].mxu1 %vm54_vm0, %v560_v33 }
 0x91b   :  { %v759_v36 = vpop.f32.mrb[4].mxu1 }
 0x91c   :  { %v648_v37 = vadd.f32 %v759_v36, %v569_v35  ;;  %v642_v38 = vpop.f32.mrb[5].mxu1 }
 0x91d   :  { %v643_v39 = vadd.f32 %v642_v38, %v569_v35 }
 0x91e   :  { %v652_v40 = vadd.f32 %v648_v37, %v1033_v48 }
 0x91f   :  { %v651_v41 = vadd.f32 %v643_v39, %v1035_v49 }
 0x920   :  { %654 = vst.msk [vmem:[#allocation7 + $0x8] sm:$0xff] %vm54_vm0, %v652_v40 }
 0x921   :  { %653 = vst.msk [vmem:[#allocation7] sm:$0xff] %vm54_vm0, %v651_v41 }
 0x922   :  { %876 = shalt.err (!%p873_p6)
}
 0x923   :  { %s877_s14 = scalar_lea.hbm %s1077_s5, 256 }
 0x924   :  { %p878_p7 = scmp.ne.s32.totalorder %s1077_s5, %s877_s14  ;;  %p881_p8 = scmp.lt.u32.totalorder %s877_s14, %s1077_s5 }
 0x926   :  { %p883_p9 = pnand %p881_p8, %p878_p7 }
 0x928   :  { %886 = shalt.err (!%p883_p9)
}
 0x929   :  { %666 = dma.vmem_to_hbm [thread:$0]  %s661_s10, 256, %s1077_s5, [#allocation4], %s895_s1, %s895_s1, %s896_s15  }
 0x92a   :  { %891 = dma.done.wait [#allocation4], 256  }
 0x92b   :  { %892 = vsyncadd [#allocation4], 4294967040 }
 0x92c   :  { %670 = vsyncpa [#allocation3], 1 }
 0x92d   :  { %671 = vsyncpa [#allocation6], 1 }
 0x92e   :  { %672 = vsyncpa [#allocation4], 1 }

</bundles_post_ra>
